<compile_context>
chip_gen: v5e
topology: v5e:2x2
jax: 0.10.0
libtpu: 0.0.40
codegen_flags: <defaults>
</compile_context>

<pallas_src>
from functools import partial

import jax
import jax.numpy as jnp
from jax.experimental import pallas as pl
from jax.experimental.pallas import tpu as pltpu

# Hyper-parameters (stand-ins for `default.NUM_LAYERS` / `default.HIDDEN_DIM`)
NUM_LAYERS = 2
HIDDEN_DIM = 32
HIDDEN_INPUT = 64   # kwargs 'hidden_input'
LAST_DIM = 64       # kwargs 'last_dim'
LANE = 128


def drqn_kernel(x_ref, state0_ref, w_first_ref, w_lstm0_ref, w_lstm1_ref,
                w_last_ref, b_ref, q_ref, state_ref):
    H = HIDDEN_DIM
    t = pl.program_id(1)

    # t == 0: load the initial (h, c) of this batch tile into the carried state block
    # (state_ref is the second output; constant block index over T keeps it resident).
    @pl.when(t == 0)
    def _():
        state_ref[...] = state0_ref[...]

    # ---- first_layer: Linear(in_dim, 64) -> ReLU -> Linear(64, HIDDEN_INPUT) -> ReLU
    x = x_ref[0]                                   # (BT, in_dim)
    in_dim = x.shape[1]
    w1 = w_first_ref[0:in_dim, :]                  # (in_dim, 64)
    w2 = w_first_ref[in_dim:in_dim + 64, :]        # (64, HIDDEN_INPUT)
    b1 = b_ref[0:1, 0:64]
    b2 = b_ref[1:2, 0:HIDDEN_INPUT]
    h = jnp.maximum(jnp.dot(x, w1, preferred_element_type=jnp.float32) + b1, 0.0)
    h = jnp.maximum(jnp.dot(h, w2, preferred_element_type=jnp.float32) + b2, 0.0)

    # ---- stacked LSTM cells, one time step. Gate column order is [i, f, o, g].
    w_lstm_refs = (w_lstm0_ref, w_lstm1_ref)
    layer_in = h
    for l in range(NUM_LAYERS):
        h_prev = state_ref[:, (2 * l) * H:(2 * l + 1) * H]
        c_prev = state_ref[:, (2 * l + 1) * H:(2 * l + 2) * H]
        k_in = layer_in.shape[1]
        w_ref = w_lstm_refs[l]
        wih = w_ref[0:k_in, :]                     # (k_in, 4H)
        whh = w_ref[k_in:k_in + H, :]              # (H, 4H)
        b = b_ref[2 + l:3 + l, 0:4 * H]            # bih + bhh, pre-summed, reordered
        # Two accumulated MXU dots (no lane concat of [layer_in, h_prev]).
        gates = (jnp.dot(layer_in, wih, preferred_element_type=jnp.float32)
                 + jnp.dot(h_prev, whh, preferred_element_type=jnp.float32) + b)
        sig = jax.nn.sigmoid(gates[:, 0:3 * H])    # [i | f | o] in one contiguous slab
        g_g = jnp.tanh(gates[:, 3 * H:4 * H])      # g
        i_g = sig[:, 0:H]
        f_g = sig[:, H:2 * H]
        o_g = sig[:, 2 * H:3 * H]
        c_new = f_g * c_prev + i_g * g_g
        h_new = o_g * jnp.tanh(c_new)
        # Store directly into the carried-state slices (masked lane stores).
        state_ref[:, (2 * l) * H:(2 * l + 1) * H] = h_new
        state_ref[:, (2 * l + 1) * H:(2 * l + 2) * H] = c_new
        layer_in = h_new

    # ---- last_layer: ReLU -> Linear(H, LAST_DIM) -> ReLU -> Linear(LAST_DIM, out_dim)
    y = jnp.maximum(layer_in, 0.0)
    w3 = w_last_ref[0:H, 0:LAST_DIM]               # (H, LAST_DIM)
    w4 = w_last_ref[H:H + LAST_DIM, :]             # (LAST_DIM, 128) zero-padded cols
    b3 = b_ref[4:5, 0:LAST_DIM]
    b4 = b_ref[5:6, :]                             # (1, 128) zero-padded
    y = jnp.maximum(jnp.dot(y, w3, preferred_element_type=jnp.float32) + b3, 0.0)
    q_ref[0] = jnp.dot(y, w4, preferred_element_type=jnp.float32) + b4


# ------------------------------- host-side packing -------------------------------

def _reorder_gate_cols(a):
    """Reorder gate columns [i, f, g, o] (PyTorch order) -> [i, f, o, g]."""
    H = HIDDEN_DIM
    return jnp.concatenate(
        [a[..., 0:2 * H], a[..., 3 * H:4 * H], a[..., 2 * H:3 * H]], axis=-1)


def pack_params(p):
    """Pack 16 parameter tensors into 5 lane/sublane-friendly arrays."""
    out_dim = p["w4"].shape[1]
    assert out_dim <= LANE and LAST_DIM <= LANE and 4 * HIDDEN_DIM == LANE

    w_first = jnp.concatenate([p["w1"], p["w2"]], axis=0)                  # (in+64, 64)
    w_lstm0 = jnp.concatenate([_reorder_gate_cols(p["wih0"]),
                               _reorder_gate_cols(p["whh0"])], axis=0)     # (96, 128)
    w_lstm1 = jnp.concatenate([_reorder_gate_cols(p["wih1"]),
                               _reorder_gate_cols(p["whh1"])], axis=0)     # (64, 128)
    w3_pad = jnp.pad(p["w3"], ((0, 0), (0, LANE - LAST_DIM)))              # (32, 128)
    w4_pad = jnp.pad(p["w4"], ((0, 0), (0, LANE - out_dim)))               # (64, 128)
    w_last = jnp.concatenate([w3_pad, w4_pad], axis=0)                     # (96, 128)

    def row(v):
        v = jnp.reshape(v, (1, -1)).astype(jnp.float32)
        return jnp.pad(v, ((0, 0), (0, LANE - v.shape[1])))

    biases = jnp.concatenate([
        row(p["b1"]), row(p["b2"]),
        row(_reorder_gate_cols(p["bih0"] + p["bhh0"])),
        row(_reorder_gate_cols(p["bih1"] + p["bhh1"])),
        row(p["b3"]), row(p["b4"]),
        jnp.zeros((2, LANE), jnp.float32),
    ], axis=0)                                                             # (8, 128)
    return w_first, w_lstm0, w_lstm1, w_last, biases


def pack_state(h0, c0):
    """(L, B, H) h/c -> (B, [h0 | c0 | h1 | c1]) = (B, 128)."""
    parts = []
    for l in range(NUM_LAYERS):
        parts += [h0[l], c0[l]]
    return jnp.concatenate(parts, axis=-1)


def _default_batch_tile(B):
    if B <= 256:
        return B
    for bt in (256, 128, 64, 32, 16, 8):
        if B % bt == 0:
            return bt
    return B


# ---------------------------------- entry points ----------------------------------

@partial(jax.jit, static_argnames=("batch_tile",))
def drqn_rollout(xs, h0, c0, params, batch_tile=None):
    """Fused T-step rollout. xs: (T, B, in_dim); h0/c0: (NUM_LAYERS, B, HIDDEN_DIM)."""
    T, B, in_dim = xs.shape
    H = HIDDEN_DIM
    out_dim = params["w4"].shape[1]
    BT = batch_tile if batch_tile is not None else _default_batch_tile(B)
    assert B % BT == 0 and (BT == B or BT % 8 == 0), "bad batch tile"

    w_first, w_lstm0, w_lstm1, w_last, biases = pack_params(params)
    state0 = pack_state(h0, c0)
    state_w = 2 * NUM_LAYERS * H                                           # 128

    const = lambda b, t: (0, 0)                    # weights: resident across all steps
    q_pad, state_out = pl.pallas_call(
        drqn_kernel,
        out_shape=(
            jax.ShapeDtypeStruct((T, B, LANE), jnp.float32),   # q, lane-padded, per step
            jax.ShapeDtypeStruct((B, state_w), jnp.float32),   # final [h | c] per layer
        ),
        grid=(B // BT, T),
        in_specs=[
            pl.BlockSpec((1, BT, in_dim), lambda b, t: (t, b, 0)),  # x streamed per step
            pl.BlockSpec((BT, state_w), lambda b, t: (b, 0)),       # initial state
            pl.BlockSpec(w_first.shape, const),
            pl.BlockSpec(w_lstm0.shape, const),
            pl.BlockSpec(w_lstm1.shape, const),
            pl.BlockSpec(w_last.shape, const),
            pl.BlockSpec(biases.shape, const),
        ],
        out_specs=(
            pl.BlockSpec((1, BT, LANE), lambda b, t: (t, b, 0)),    # q per step
            pl.BlockSpec((BT, state_w), lambda b, t: (b, 0)),       # carried h/c state
        ),
        compiler_params=pltpu.CompilerParams(
            dimension_semantics=("parallel", "arbitrary")),
    )(xs, state0, w_first, w_lstm0, w_lstm1, w_last, biases)

    q = q_pad[..., :out_dim]
    h_next = jnp.stack([state_out[:, (2 * l) * H:(2 * l + 1) * H]
                        for l in range(NUM_LAYERS)], axis=0)
    c_next = jnp.stack([state_out[:, (2 * l + 1) * H:(2 * l + 2) * H]
                        for l in range(NUM_LAYERS)], axis=0)
    return q, h_next, c_next


def drqn_forward(x, h0, c0, params):
    """Single-step forward: exactly the PyTorch module's forward()."""
    q, h_next, c_next = drqn_rollout(x[None], h0, c0, params)
    return q[0], h_next, c_next


# ----------------------------------- references -----------------------------------

def drqn_reference_step(x, h0, c0, p):
    """Pure-JAX single-step reference (same math as the PyTorch module)."""
    h = jnp.maximum(x @ p["w1"] + p["b1"], 0.0)
    h = jnp.maximum(h @ p["w2"] + p["b2"], 0.0)
    H = HIDDEN_DIM
    hs, cs = [], []
    layer_in = h
    lstm = [(p["wih0"], p["whh0"], p["bih0"], p["bhh0"]),
            (p["wih1"], p["whh1"], p["bih1"], p["bhh1"])]
    for l, (wih, whh, bih, bhh) in enumerate(lstm):
        gates = layer_in @ wih + bih + h0[l] @ whh + bhh
        i_g = jax.nn.sigmoid(gates[:, 0 * H:1 * H])
        f_g = jax.nn.sigmoid(gates[:, 1 * H:2 * H])
        g_g = jnp.tanh(gates[:, 2 * H:3 * H])
        o_g = jax.nn.sigmoid(gates[:, 3 * H:4 * H])
        c_new = f_g * c0[l] + i_g * g_g
        h_new = o_g * jnp.tanh(c_new)
        hs.append(h_new)
        cs.append(c_new)
        layer_in = h_new
    y = jnp.maximum(layer_in, 0.0)
    y = jnp.maximum(y @ p["w3"] + p["b3"], 0.0)
    q = y @ p["w4"] + p["b4"]
    return q, jnp.stack(hs), jnp.stack(cs)


def drqn_reference_rollout(xs, h0, c0, p):
    qs, h, c = [], h0, c0
    for t in range(xs.shape[0]):
        q, h, c = drqn_reference_step(xs[t], h, c, p)
        qs.append(q)
    return jnp.stack(qs), h, c


def init_params(key, in_dim, out_dim):
    ks = jax.random.split(key, 16)
    s = 0.1
    return {
        "w1": s * jax.random.normal(ks[0], (in_dim, 64), jnp.float32),
        "b1": s * jax.random.normal(ks[1], (1, 64), jnp.float32),
        "w2": s * jax.random.normal(ks[2], (64, HIDDEN_INPUT), jnp.float32),
        "b2": s * jax.random.normal(ks[3], (1, HIDDEN_INPUT), jnp.float32),
        # LSTM layer 0: input size = HIDDEN_INPUT
        "wih0": s * jax.random.normal(ks[4], (HIDDEN_INPUT, 4 * HIDDEN_DIM), jnp.float32),
        "whh0": s * jax.random.normal(ks[5], (HIDDEN_DIM, 4 * HIDDEN_DIM), jnp.float32),
        "bih0": s * jax.random.normal(ks[6], (1, 4 * HIDDEN_DIM), jnp.float32),
        "bhh0": s * jax.random.normal(ks[7], (1, 4 * HIDDEN_DIM), jnp.float32),
        # LSTM layer 1: input size = HIDDEN_DIM
        "wih1": s * jax.random.normal(ks[8], (HIDDEN_DIM, 4 * HIDDEN_DIM), jnp.float32),
        "whh1": s * jax.random.normal(ks[9], (HIDDEN_DIM, 4 * HIDDEN_DIM), jnp.float32),
        "bih1": s * jax.random.normal(ks[10], (1, 4 * HIDDEN_DIM), jnp.float32),
        "bhh1": s * jax.random.normal(ks[11], (1, 4 * HIDDEN_DIM), jnp.float32),
        "w3": s * jax.random.normal(ks[12], (HIDDEN_DIM, LAST_DIM), jnp.float32),
        "b3": s * jax.random.normal(ks[13], (1, LAST_DIM), jnp.float32),
        "w4": s * jax.random.normal(ks[14], (LAST_DIM, out_dim), jnp.float32),
        "b4": s * jax.random.normal(ks[15], (1, out_dim), jnp.float32),
    }


if __name__ == "__main__":
    in_dim, out_dim = 16, 4
    B, T = 16, 8                              # batched environments, T-step rollout
    key = jax.random.PRNGKey(0)
    kx, kh, kc, kp = jax.random.split(key, 4)

    xs = jax.random.normal(kx, (T, B, in_dim), jnp.float32)
    h0 = jax.random.normal(kh, (NUM_LAYERS, B, HIDDEN_DIM), jnp.float32)
    c0 = jax.random.normal(kc, (NUM_LAYERS, B, HIDDEN_DIM), jnp.float32)
    params = init_params(kp, in_dim, out_dim)

    # 1) Single-step forward == the PyTorch module's forward().
    q1, h1, c1 = drqn_forward(xs[0], h0, c0, params)
    jax.block_until_ready((q1, h1, c1))
    q1_ref, h1_ref, c1_ref = drqn_reference_step(xs[0], h0, c0, params)
    assert jnp.allclose(q1, q1_ref, atol=1e-4, rtol=1e-4), "q mismatch (single step)"
    assert jnp.allclose(h1, h1_ref, atol=1e-4, rtol=1e-4), "h mismatch (single step)"
    assert jnp.allclose(c1, c1_ref, atol=1e-4, rtol=1e-4), "c mismatch (single step)"

    # 2) Fused T-step rollout (grid over T, resident weights, VMEM-carried h/c,
    #    parallel batch-tile axis). batch_tile=8 -> grid (2, T).
    q_roll, hT, cT = drqn_rollout(xs, h0, c0, params, batch_tile=8)
    jax.block_until_ready((q_roll, hT, cT))
    q_ref, h_ref, c_ref = drqn_reference_rollout(xs, h0, c0, params)
    assert jnp.allclose(q_roll, q_ref, atol=2e-4, rtol=1e-4), "q mismatch (rollout)"
    assert jnp.allclose(hT, h_ref, atol=2e-4, rtol=1e-4), "h mismatch (rollout)"
    assert jnp.allclose(cT, c_ref, atol=2e-4, rtol=1e-4), "c mismatch (rollout)"

    print("KERNEL_OK")
</pallas_src>

<mosaic_0001>
module attributes {stable_mosaic.version = 11 : i64} {
  func.func @drqn_kernel(%arg0: i32, %arg1: i32, %arg2: memref<1x16x16xf32, #tpu.memory_space<vmem>>, %arg3: memref<16x128xf32, #tpu.memory_space<vmem>>, %arg4: memref<80x64xf32, #tpu.memory_space<vmem>>, %arg5: memref<96x128xf32, #tpu.memory_space<vmem>>, %arg6: memref<64x128xf32, #tpu.memory_space<vmem>>, %arg7: memref<96x128xf32, #tpu.memory_space<vmem>>, %arg8: memref<8x128xf32, #tpu.memory_space<vmem>>, %arg9: memref<1x16x128xf32, #tpu.memory_space<vmem>>, %arg10: memref<16x128xf32, #tpu.memory_space<vmem>>) attributes {dimension_semantics = [#tpu.dimension_semantics<parallel>, #tpu.dimension_semantics<arbitrary>], iteration_bounds = array<i64: 1, 1>, scalar_prefetch = 0 : i64, scratch_operands = 0 : i64, tpu.core_type = #tpu.core_type<tc>, window_params = [{transform_indices = @transform_0, window_bounds = array<i64: 1, 16, 16>}, {transform_indices = @transform_1, window_bounds = array<i64: 16, 128>}, {pipeline_mode = #tpu.pipeline_mode<synchronous>, transform_indices = @transform_2, window_bounds = array<i64: 80, 64>}, {pipeline_mode = #tpu.pipeline_mode<synchronous>, transform_indices = @transform_3, window_bounds = array<i64: 96, 128>}, {pipeline_mode = #tpu.pipeline_mode<synchronous>, transform_indices = @transform_4, window_bounds = array<i64: 64, 128>}, {pipeline_mode = #tpu.pipeline_mode<synchronous>, transform_indices = @transform_5, window_bounds = array<i64: 96, 128>}, {pipeline_mode = #tpu.pipeline_mode<synchronous>, transform_indices = @transform_6, window_bounds = array<i64: 8, 128>}, {transform_indices = @transform_7, window_bounds = array<i64: 1, 16, 128>}, {transform_indices = @transform_8, window_bounds = array<i64: 16, 128>}]} {
    %c0_i32 = arith.constant 0 : i32
    %0 = arith.cmpi eq, %arg1, %c0_i32 : i32
    %1 = arith.extui %0 : i1 to i32
    %c0_i32_0 = arith.constant 0 : i32
    %2 = arith.cmpi ne, %1, %c0_i32_0 : i32
    scf.if %2 {
      %c0_54 = arith.constant 0 : index
      %c0_55 = arith.constant 0 : index
      %92 = vector.load %arg3[%c0_54, %c0_55] : memref<16x128xf32, #tpu.memory_space<vmem>>, vector<16x128xf32>
      %c0_56 = arith.constant 0 : index
      %c0_57 = arith.constant 0 : index
      %93 = vector.load %arg10[%c0_56, %c0_57] : memref<16x128xf32, #tpu.memory_space<vmem>>, vector<16x128xf32>
      tpu.vector_store %arg10[%c0_56, %c0_57], %92 {strides = array<i32>} : memref<16x128xf32, #tpu.memory_space<vmem>>, vector<16x128xf32>,
    } else {
    }
    %c0 = arith.constant 0 : index
    %c0_1 = arith.constant 0 : index
    %c0_2 = arith.constant 0 : index
    %3 = vector.load %arg2[%c0, %c0_1, %c0_2] : memref<1x16x16xf32, #tpu.memory_space<vmem>>, vector<1x16x16xf32>
    %4 = vector.shape_cast %3 : vector<1x16x16xf32> to vector<16x16xf32>
    %c0_3 = arith.constant 0 : index
    %c0_4 = arith.constant 0 : index
    %5 = vector.load %arg4[%c0_3, %c0_4] : memref<80x64xf32, #tpu.memory_space<vmem>>, vector<16x64xf32>
    %c16 = arith.constant 16 : index
    %c0_5 = arith.constant 0 : index
    %6 = vector.load %arg4[%c16, %c0_5] : memref<80x64xf32, #tpu.memory_space<vmem>>, vector<64x64xf32>
    %c0_6 = arith.constant 0 : index
    %c0_7 = arith.constant 0 : index
    %7 = vector.load %arg8[%c0_6, %c0_7] : memref<8x128xf32, #tpu.memory_space<vmem>>, vector<1x64xf32>
    %c1 = arith.constant 1 : index
    %c0_8 = arith.constant 0 : index
    %8 = vector.load %arg8[%c1, %c0_8] : memref<8x128xf32, #tpu.memory_space<vmem>>, vector<1x64xf32>
    %cst = arith.constant dense<0.000000e+00> : vector<16x64xf32>
    %9 = tpu.matmul %4, %5, %cst {dimension_numbers = #tpu.dot_dimension_numbers<[1], [0], [0], [1], [0, 0, 1, 1], [], []>} : vector<16x16xf32>, vector<16x64xf32>, vector<16x64xf32> -> vector<16x64xf32>
    %10 = vector.broadcast %7 : vector<1x64xf32> to vector<16x64xf32>
    %11 = arith.addf %9, %10 : vector<16x64xf32>
    %cst_9 = arith.constant 0.000000e+00 : f32
    %12 = vector.broadcast %cst_9 : f32 to vector<16x64xf32>
    %13 = arith.maximumf %11, %12 : vector<16x64xf32>
    %cst_10 = arith.constant dense<0.000000e+00> : vector<16x64xf32>
    %14 = tpu.matmul %13, %6, %cst_10 {dimension_numbers = #tpu.dot_dimension_numbers<[1], [0], [0], [1], [0, 0, 1, 1], [], []>} : vector<16x64xf32>, vector<64x64xf32>, vector<16x64xf32> -> vector<16x64xf32>
    %15 = vector.broadcast %8 : vector<1x64xf32> to vector<16x64xf32>
    %16 = arith.addf %14, %15 : vector<16x64xf32>
    %cst_11 = arith.constant 0.000000e+00 : f32
    %17 = vector.broadcast %cst_11 : f32 to vector<16x64xf32>
    %18 = arith.maximumf %16, %17 : vector<16x64xf32>
    %c0_12 = arith.constant 0 : index
    %c0_13 = arith.constant 0 : index
    %19 = vector.load %arg10[%c0_12, %c0_13] : memref<16x128xf32, #tpu.memory_space<vmem>>, vector<16x32xf32>
    %c0_14 = arith.constant 0 : index
    %c32 = arith.constant 32 : index
    %20 = vector.load %arg10[%c0_14, %c32] : memref<16x128xf32, #tpu.memory_space<vmem>>, vector<16x32xf32>
    %c0_15 = arith.constant 0 : index
    %c0_16 = arith.constant 0 : index
    %21 = vector.load %arg5[%c0_15, %c0_16] : memref<96x128xf32, #tpu.memory_space<vmem>>, vector<64x128xf32>
    %c64 = arith.constant 64 : index
    %c0_17 = arith.constant 0 : index
    %22 = vector.load %arg5[%c64, %c0_17] : memref<96x128xf32, #tpu.memory_space<vmem>>, vector<32x128xf32>
    %c2 = arith.constant 2 : index
    %c0_18 = arith.constant 0 : index
    %23 = vector.load %arg8[%c2, %c0_18] : memref<8x128xf32, #tpu.memory_space<vmem>>, vector<1x128xf32>
    %cst_19 = arith.constant dense<0.000000e+00> : vector<16x128xf32>
    %24 = tpu.matmul %18, %21, %cst_19 {dimension_numbers = #tpu.dot_dimension_numbers<[1], [0], [0], [1], [0, 0, 1, 1], [], []>} : vector<16x64xf32>, vector<64x128xf32>, vector<16x128xf32> -> vector<16x128xf32>
    %cst_20 = arith.constant dense<0.000000e+00> : vector<16x128xf32>
    %25 = tpu.matmul %19, %22, %cst_20 {dimension_numbers = #tpu.dot_dimension_numbers<[1], [0], [0], [1], [0, 0, 1, 1], [], []>} : vector<16x32xf32>, vector<32x128xf32>, vector<16x128xf32> -> vector<16x128xf32>
    %26 = arith.addf %24, %25 : vector<16x128xf32>
    %27 = vector.broadcast %23 : vector<1x128xf32> to vector<16x128xf32>
    %28 = arith.addf %26, %27 : vector<16x128xf32>
    %29 = vector.extract_strided_slice %28 {offsets = [0, 0], sizes = [16, 96], strides = [1, 1]} : vector<16x128xf32> to vector<16x96xf32>
    %30 = arith.negf %29 : vector<16x96xf32>
    %31 = math.exp %30 : vector<16x96xf32>
    %cst_21 = arith.constant 1.000000e+00 : f32
    %32 = vector.broadcast %cst_21 : f32 to vector<16x96xf32>
    %33 = arith.addf %32, %31 : vector<16x96xf32>
    %34 = arith.divf %32, %33 : vector<16x96xf32>
    %35 = vector.extract_strided_slice %28 {offsets = [0, 96], sizes = [16, 32], strides = [1, 1]} : vector<16x128xf32> to vector<16x32xf32>
    %36 = math.tanh %35 : vector<16x32xf32>
    %37 = vector.extract_strided_slice %34 {offsets = [0, 0], sizes = [16, 32], strides = [1, 1]} : vector<16x96xf32> to vector<16x32xf32>
    %38 = vector.extract_strided_slice %34 {offsets = [0, 32], sizes = [16, 32], strides = [1, 1]} : vector<16x96xf32> to vector<16x32xf32>
    %39 = vector.extract_strided_slice %34 {offsets = [0, 64], sizes = [16, 32], strides = [1, 1]} : vector<16x96xf32> to vector<16x32xf32>
    %40 = arith.mulf %38, %20 : vector<16x32xf32>
    %41 = arith.mulf %37, %36 : vector<16x32xf32>
    %42 = arith.addf %40, %41 : vector<16x32xf32>
    %43 = math.tanh %42 : vector<16x32xf32>
    %44 = arith.mulf %39, %43 : vector<16x32xf32>
    %c0_22 = arith.constant 0 : index
    %c0_23 = arith.constant 0 : index
    %45 = vector.load %arg10[%c0_22, %c0_23] : memref<16x128xf32, #tpu.memory_space<vmem>>, vector<16x32xf32>
    tpu.vector_store %arg10[%c0_22, %c0_23], %44 {strides = array<i32>} : memref<16x128xf32, #tpu.memory_space<vmem>>, vector<16x32xf32>,
    %c0_24 = arith.constant 0 : index
    %c32_25 = arith.constant 32 : index
    %46 = vector.load %arg10[%c0_24, %c32_25] : memref<16x128xf32, #tpu.memory_space<vmem>>, vector<16x32xf32>
    tpu.vector_store %arg10[%c0_24, %c32_25], %42 {strides = array<i32>} : memref<16x128xf32, #tpu.memory_space<vmem>>, vector<16x32xf32>,
    %c0_26 = arith.constant 0 : index
    %c64_27 = arith.constant 64 : index
    %47 = vector.load %arg10[%c0_26, %c64_27] : memref<16x128xf32, #tpu.memory_space<vmem>>, vector<16x32xf32>
    %c0_28 = arith.constant 0 : index
    %c96 = arith.constant 96 : index
    %48 = vector.load %arg10[%c0_28, %c96] : memref<16x128xf32, #tpu.memory_space<vmem>>, vector<16x32xf32>
    %c0_29 = arith.constant 0 : index
    %c0_30 = arith.constant 0 : index
    %49 = vector.load %arg6[%c0_29, %c0_30] : memref<64x128xf32, #tpu.memory_space<vmem>>, vector<32x128xf32>
    %c32_31 = arith.constant 32 : index
    %c0_32 = arith.constant 0 : index
    %50 = vector.load %arg6[%c32_31, %c0_32] : memref<64x128xf32, #tpu.memory_space<vmem>>, vector<32x128xf32>
    %c3 = arith.constant 3 : index
    %c0_33 = arith.constant 0 : index
    %51 = vector.load %arg8[%c3, %c0_33] : memref<8x128xf32, #tpu.memory_space<vmem>>, vector<1x128xf32>
    %cst_34 = arith.constant dense<0.000000e+00> : vector<16x128xf32>
    %52 = tpu.matmul %44, %49, %cst_34 {dimension_numbers = #tpu.dot_dimension_numbers<[1], [0], [0], [1], [0, 0, 1, 1], [], []>} : vector<16x32xf32>, vector<32x128xf32>, vector<16x128xf32> -> vector<16x128xf32>
    %cst_35 = arith.constant dense<0.000000e+00> : vector<16x128xf32>
    %53 = tpu.matmul %47, %50, %cst_35 {dimension_numbers = #tpu.dot_dimension_numbers<[1], [0], [0], [1], [0, 0, 1, 1], [], []>} : vector<16x32xf32>, vector<32x128xf32>, vector<16x128xf32> -> vector<16x128xf32>
    %54 = arith.addf %52, %53 : vector<16x128xf32>
    %55 = vector.broadcast %51 : vector<1x128xf32> to vector<16x128xf32>
    %56 = arith.addf %54, %55 : vector<16x128xf32>
    %57 = vector.extract_strided_slice %56 {offsets = [0, 0], sizes = [16, 96], strides = [1, 1]} : vector<16x128xf32> to vector<16x96xf32>
    %58 = arith.negf %57 : vector<16x96xf32>
    %59 = math.exp %58 : vector<16x96xf32>
    %cst_36 = arith.constant 1.000000e+00 : f32
    %60 = vector.broadcast %cst_36 : f32 to vector<16x96xf32>
    %61 = arith.addf %60, %59 : vector<16x96xf32>
    %62 = arith.divf %60, %61 : vector<16x96xf32>
    %63 = vector.extract_strided_slice %56 {offsets = [0, 96], sizes = [16, 32], strides = [1, 1]} : vector<16x128xf32> to vector<16x32xf32>
    %64 = math.tanh %63 : vector<16x32xf32>
    %65 = vector.extract_strided_slice %62 {offsets = [0, 0], sizes = [16, 32], strides = [1, 1]} : vector<16x96xf32> to vector<16x32xf32>
    %66 = vector.extract_strided_slice %62 {offsets = [0, 32], sizes = [16, 32], strides = [1, 1]} : vector<16x96xf32> to vector<16x32xf32>
    %67 = vector.extract_strided_slice %62 {offsets = [0, 64], sizes = [16, 32], strides = [1, 1]} : vector<16x96xf32> to vector<16x32xf32>
    %68 = arith.mulf %66, %48 : vector<16x32xf32>
    %69 = arith.mulf %65, %64 : vector<16x32xf32>
    %70 = arith.addf %68, %69 : vector<16x32xf32>
    %71 = math.tanh %70 : vector<16x32xf32>
    %72 = arith.mulf %67, %71 : vector<16x32xf32>
    %c0_37 = arith.constant 0 : index
    %c64_38 = arith.constant 64 : index
    %73 = vector.load %arg10[%c0_37, %c64_38] : memref<16x128xf32, #tpu.memory_space<vmem>>, vector<16x32xf32>
    tpu.vector_store %arg10[%c0_37, %c64_38], %72 {strides = array<i32>} : memref<16x128xf32, #tpu.memory_space<vmem>>, vector<16x32xf32>,
    %c0_39 = arith.constant 0 : index
    %c96_40 = arith.constant 96 : index
    %74 = vector.load %arg10[%c0_39, %c96_40] : memref<16x128xf32, #tpu.memory_space<vmem>>, vector<16x32xf32>
    tpu.vector_store %arg10[%c0_39, %c96_40], %70 {strides = array<i32>} : memref<16x128xf32, #tpu.memory_space<vmem>>, vector<16x32xf32>,
    %cst_41 = arith.constant 0.000000e+00 : f32
    %75 = vector.broadcast %cst_41 : f32 to vector<16x32xf32>
    %76 = arith.maximumf %72, %75 : vector<16x32xf32>
    %c0_42 = arith.constant 0 : index
    %c0_43 = arith.constant 0 : index
    %77 = vector.load %arg7[%c0_42, %c0_43] : memref<96x128xf32, #tpu.memory_space<vmem>>, vector<32x64xf32>
    %c32_44 = arith.constant 32 : index
    %c0_45 = arith.constant 0 : index
    %78 = vector.load %arg7[%c32_44, %c0_45] : memref<96x128xf32, #tpu.memory_space<vmem>>, vector<64x128xf32>
    %c4 = arith.constant 4 : index
    %c0_46 = arith.constant 0 : index
    %79 = vector.load %arg8[%c4, %c0_46] : memref<8x128xf32, #tpu.memory_space<vmem>>, vector<1x64xf32>
    %c5 = arith.constant 5 : index
    %c0_47 = arith.constant 0 : index
    %80 = vector.load %arg8[%c5, %c0_47] : memref<8x128xf32, #tpu.memory_space<vmem>>, vector<1x128xf32>
    %cst_48 = arith.constant dense<0.000000e+00> : vector<16x64xf32>
    %81 = tpu.matmul %76, %77, %cst_48 {dimension_numbers = #tpu.dot_dimension_numbers<[1], [0], [0], [1], [0, 0, 1, 1], [], []>} : vector<16x32xf32>, vector<32x64xf32>, vector<16x64xf32> -> vector<16x64xf32>
    %82 = vector.broadcast %79 : vector<1x64xf32> to vector<16x64xf32>
    %83 = arith.addf %81, %82 : vector<16x64xf32>
    %cst_49 = arith.constant 0.000000e+00 : f32
    %84 = vector.broadcast %cst_49 : f32 to vector<16x64xf32>
    %85 = arith.maximumf %83, %84 : vector<16x64xf32>
    %cst_50 = arith.constant dense<0.000000e+00> : vector<16x128xf32>
    %86 = tpu.matmul %85, %78, %cst_50 {dimension_numbers = #tpu.dot_dimension_numbers<[1], [0], [0], [1], [0, 0, 1, 1], [], []>} : vector<16x64xf32>, vector<64x128xf32>, vector<16x128xf32> -> vector<16x128xf32>
    %87 = vector.broadcast %80 : vector<1x128xf32> to vector<16x128xf32>
    %88 = arith.addf %86, %87 : vector<16x128xf32>
    %c0_51 = arith.constant 0 : index
    %c0_52 = arith.constant 0 : index
    %c0_53 = arith.constant 0 : index
    %89 = vector.load %arg9[%c0_51, %c0_52, %c0_53] : memref<1x16x128xf32, #tpu.memory_space<vmem>>, vector<1x16x128xf32>
    %90 = vector.shape_cast %89 : vector<1x16x128xf32> to vector<16x128xf32>
    %91 = vector.shape_cast %88 : vector<16x128xf32> to vector<1x16x128xf32>
    tpu.vector_store %arg9[%c0_51, %c0_52, %c0_53], %91 {strides = array<i32>} : memref<1x16x128xf32, #tpu.memory_space<vmem>>, vector<1x16x128xf32>,
    return
  }
  func.func @transform_0(%arg0: i32, %arg1: i32) -> (i32, i32, i32) {
    %c0_i32 = arith.constant 0 : i32
    %c0_i32_0 = arith.constant 0 : i32
    return %arg1, %arg0, %c0_i32 : i32, i32, i32
  }
  func.func @transform_1(%arg0: i32, %arg1: i32) -> (i32, i32) {
    %c0_i32 = arith.constant 0 : i32
    %c0_i32_0 = arith.constant 0 : i32
    return %arg0, %c0_i32 : i32, i32
  }
  func.func @transform_2(%arg0: i32, %arg1: i32) -> (i32, i32) {
    %c0_i32 = arith.constant 0 : i32
    %c0_i32_0 = arith.constant 0 : i32
    %c0_i32_1 = arith.constant 0 : i32
    return %c0_i32, %c0_i32_0 : i32, i32
  }
  func.func @transform_3(%arg0: i32, %arg1: i32) -> (i32, i32) {
    %c0_i32 = arith.constant 0 : i32
    %c0_i32_0 = arith.constant 0 : i32
    %c0_i32_1 = arith.constant 0 : i32
    return %c0_i32, %c0_i32_0 : i32, i32
  }
  func.func @transform_4(%arg0: i32, %arg1: i32) -> (i32, i32) {
    %c0_i32 = arith.constant 0 : i32
    %c0_i32_0 = arith.constant 0 : i32
    %c0_i32_1 = arith.constant 0 : i32
    return %c0_i32, %c0_i32_0 : i32, i32
  }
  func.func @transform_5(%arg0: i32, %arg1: i32) -> (i32, i32) {
    %c0_i32 = arith.constant 0 : i32
    %c0_i32_0 = arith.constant 0 : i32
    %c0_i32_1 = arith.constant 0 : i32
    return %c0_i32, %c0_i32_0 : i32, i32
  }
  func.func @transform_6(%arg0: i32, %arg1: i32) -> (i32, i32) {
    %c0_i32 = arith.constant 0 : i32
    %c0_i32_0 = arith.constant 0 : i32
    %c0_i32_1 = arith.constant 0 : i32
    return %c0_i32, %c0_i32_0 : i32, i32
  }
  func.func @transform_7(%arg0: i32, %arg1: i32) -> (i32, i32, i32) {
    %c0_i32 = arith.constant 0 : i32
    %c0_i32_0 = arith.constant 0 : i32
    return %arg1, %arg0, %c0_i32 : i32, i32, i32
  }
  func.func @transform_8(%arg0: i32, %arg1: i32) -> (i32, i32) {
    %c0_i32 = arith.constant 0 : i32
    %c0_i32_0 = arith.constant 0 : i32
    return %arg0, %c0_i32 : i32, i32
  }
}

</mosaic_0001>

<bundles_post_ra>
// kernel: drqn_rollout.1
= control target key start
LH: loop header
LB: loop body
LE: loop exit
PB: predicated region body
PF: predicated region fallthrough
CT: control target
= control target key end

     0   :  { %vm51_vm0 = vcmask 130048   ;;  %vm84_vm1 = vcmask 523264   ;;  %vm131_vm2 = vcmask 261120   ;;  %s604_s17 = smov 32   ;;  %s605_s26 = smov 64   ;;  %vm277_vm11 = vcmask 523520   ;;  %s909_s2 = inlined_call_operand.vmem [shape: f32[80,64], index: 2, kind: input, shape index: {}]   ;;  %s910_s0 = inlined_call_operand.vmem [shape: f32[1,16,16], index: 0, kind: input, shape index: {}]   ;;  %s911_s6 = inlined_call_operand.vmem [shape: f32[8,128], index: 6, kind: input, shape index: {}]   ;;  %s912_s3 = inlined_call_operand.vmem [shape: f32[96,128], index: 3, kind: input, shape index: {}]   ;;  %s913_s1 = inlined_call_operand.vmem [shape: f32[16,128], index: 1, kind: input, shape index: {}]   ;;  %s914_s8 = inlined_call_operand.vmem [shape: f32[16,128], index: 8, kind: output, shape index: {1}]   ;;  %s915_s4 = inlined_call_operand.vmem [shape: f32[64,128], index: 4, kind: input, shape index: {}]   ;;  %s916_s5 = inlined_call_operand.vmem [shape: f32[96,128], index: 5, kind: input, shape index: {}]   ;;  %s917_s7 = inlined_call_operand.vmem [shape: f32[1,16,128], index: 7, kind: output, shape index: {0}]  }
   0x1   :  { %v39_v0 = vld [vmem:[%s909_s2 + $0x8] sm:$0xff]  ;;  %v38_v1 = vld [vmem:[%s909_s2] sm:$0xff]  ;;  %v45_v5 = vld [vmem:[%s909_s2 + $0x38] sm:$0xff] }
   0x2   :  { %72 = vmatpush.msra.mxu0 %v39_v0  ;;  %v36_v2 = vld [vmem:[%s910_s0] sm:$0xff]  ;;  %v47_v3 = vld [vmem:[%s909_s2 + $0x48] sm:$0xff]  ;;  %v44_v6 = vld [vmem:[%s909_s2 + $0x30] sm:$0xff] }
   0x3   :  { %556 = vmatpush.msra.mxu1 %v47_v3  ;;  %v46_v4 = vld [vmem:[%s909_s2 + $0x40] sm:$0xff]  ;;  %v37_v7 = vld [vmem:[%s910_s0 + $0x8] sm:$0xff]  ;;  %v41_v10 = vld [vmem:[%s909_s2 + $0x18] sm:$0xff] }
   0x4   :  { %73 = vmatpush.msra.mxu0 %v38_v1  ;;  %v43_v8 = vld [vmem:[%s909_s2 + $0x28] sm:$0xff]  ;;  %v42_v9 = vld [vmem:[%s909_s2 + $0x20] sm:$0xff]  ;;  %v40_v11 = vld [vmem:[%s909_s2 + $0x10] sm:$0xff] }
   0x5   :  { %536 = vmatmul.msk.f32.vlgmr.msra.gmra.mxu0 %vm51_vm0, %v36_v2  ;;  %557 = vmatpush.msra.mxu1 %v46_v4  ;;  %v125_v12 = vld [vmem:[%s912_s3 + $0x38] sm:$0xff]  ;;  %v124_v13 = vld [vmem:[%s912_s3 + $0x30] sm:$0xff]  ;;  %v123_v15 = vld [vmem:[%s912_s3 + $0x28] sm:$0xff] }
   0x6   :  { %99 = vmatpush.msrb.mxu0 %v47_v3  ;;  %175 = vmatpush.msra.mxu3 %v125_v12  ;;  %v129_v14 = vld [vmem:[%s912_s3 + $0x58] sm:$0xff]  ;;  %v122_v16 = vld [vmem:[%s912_s3 + $0x20] sm:$0xff]  ;;  %v128_v25 = vld [vmem:[%s912_s3 + $0x50] sm:$0xff] }
   0x7   :  { %558 = vmatpush.msra.mxu1 %v45_v5  ;;  %150 = vmatpush.msra.mxu2 %v129_v14  ;;  %v121_v17 = vld [vmem:[%s912_s3 + $0x18] sm:$0xff]  ;;  %v566_v18 = vld [vmem:[%s911_s6] ss:$0 sm:$0xff]  ;;  %v120_v26 = vld [vmem:[%s912_s3 + $0x10] sm:$0xff] }
   0x8   :  { %100 = vmatpush.msrb.mxu0 %v46_v4  ;;  %176 = vmatpush.msra.mxu3 %v124_v13  ;;  %v127_v27 = vld [vmem:[%s912_s3 + $0x48] sm:$0xff]  ;;  %v126_v29 = vld [vmem:[%s912_s3 + $0x40] sm:$0xff] }
   0x9   :  { %559 = vmatpush.msra.mxu1 %v44_v6  ;;  %151 = vmatpush.msra.mxu2 %v128_v25  ;;  %v119_v28 = vld [vmem:[%s912_s3 + $0x8] sm:$0xff]  ;;  %v118_v30 = vld [vmem:[%s912_s3] sm:$0xff]  ;;  %v285_v25 = vld [vmem:[%s915_s4 + $0x18] sm:$0xff] }
   0xa   :  { %101 = vmatpush.msrb.mxu0 %v45_v5  ;;  %177 = vmatpush.msra.mxu3 %v123_v15  ;;  %v733_v31 = vld [vmem:[%s913_s1] sm:$0xff]  ;;  %v744_v32 = vld [vmem:[%s913_s1 + $0x8] sm:$0xff] }
   0xb   :  { %560 = vmatpush.msra.mxu1 %v43_v8  ;;  %152 = vmatpush.msra.mxu2 %v127_v27  ;;  %34 = vst [vmem:[%s914_s8] sm:$0xff] %v733_v31  ;;  %v567_v33 = vld [vmem:[%s911_s6 + $0x1] ss:$0 sm:$0xff]  ;;  %v568_v41 = vld [vmem:[%s911_s6 + $0x2] ss:$0 sm:$0xff]  ;;  %v283_v27 = vld [vmem:[%s915_s4 + $0x8] sm:$0xff] }
   0xc   :  { %102 = vmatpush.msrb.mxu0 %v44_v6  ;;  %178 = vmatpush.msra.mxu3 %v122_v16  ;;  %35 = vst [vmem:[%s914_s8 + $0x8] sm:$0xff] %v744_v32 }
   0xd   :  { %537 = vmatmul.msk.f32.gmra.mxu0 %vm51_vm0, %v37_v7  ;;  %561 = vmatpush.msra.mxu1 %v42_v9 }
   0xe   :  { %103 = vmatpush.msrb.mxu0 %v43_v8  ;;  %179 = vmatpush.msra.mxu3 %v121_v17 }
   0xf   :  { %562 = vmatpush.msra.mxu1 %v41_v10  ;;  %153 = vmatpush.msra.mxu2 %v126_v29 }
  0x10   :  { %104 = vmatpush.msrb.mxu0 %v42_v9  ;;  %180 = vmatpush.msra.mxu3 %v120_v26  ;;  %v284_v26 = vld [vmem:[%s915_s4 + $0x10] sm:$0xff] }
  0x11   :  { %563 = vmatpush.msra.mxu1 %v40_v11  ;;  %540 = vmatmul.msk.f32.vlgmr.msra.gmra.mxu2 %vm131_vm2, %v733_v31 }
  0x12   :  { %105 = vmatpush.msrb.mxu0 %v41_v10  ;;  %181 = vmatpush.msra.mxu3 %v119_v28  ;;  %v282_v28 = vld [vmem:[%s915_s4] sm:$0xff] }
  0x13   :  { %340 = vmatpush.msrb.mxu2 %v285_v25 }
  0x14   :  { %106 = vmatpush.msrb.mxu0 %v40_v11  ;;  %182 = vmatpush.msra.mxu3 %v118_v30 }
  0x15   :  { %341 = vmatpush.msrb.mxu2 %v284_v26 }
  0x17   :  { %342 = vmatpush.msrb.mxu2 %v283_v27 }
  0x19   :  { %541 = vmatmul.msk.f32.gmra.mxu2 %vm131_vm2, %v744_v32 }
  0x1a   :  { %343 = vmatpush.msrb.mxu2 %v282_v28 }
  0x82   :  { %v75_v19 = vpop.f32.mrf.mxu0 }
  0x83   :  { %v76_v20 = vadd.f32 %v566_v18, %v75_v19 }
  0x85   :  { %v81_v21 = vmax.f32 %v76_v20, 0.0 }
  0x87   :  { %538 = vmatmul.msk.f32.vlgmr.msrb.gmra.mxu0 %vm84_vm1, %v81_v21 }
  0x8a   :  { %v78_v22 = vpop.f32.mrf.mxu0 }
  0x8b   :  { %v79_v23 = vadd.f32 %v566_v18, %v78_v22 }
  0x8d   :  { %v82_v24 = vmax.f32 %v79_v23, 0.0 }
  0x8f   :  { %539 = vmatmul.msk.f32.vlgmr.msra.gmra.mxu1 %vm84_vm1, %v82_v24 }
  0x94   :  { %v155_v40 = vpop.f32.mrf.mxu2 }
  0x9c   :  { %v158_v45 = vpop.f32.mrf.mxu2 }
 0x104   :  { %v108_v34 = vpop.f32.mrf.mxu0 }
 0x105   :  { %v109_v35 = vadd.f32 %v567_v33, %v108_v34  ;;  %v288_v34 = vld [vmem:[%s915_s4 + $0x30] sm:$0xff] }
 0x107   :  { %v114_v36 = vmax.f32 %v109_v35, 0.0  ;;  %v287_v35 = vld [vmem:[%s915_s4 + $0x28] sm:$0xff] }
 0x109   :  { %542 = vmatmul.msk.f32.vlgmr.msra.gmra.mxu3 %vm84_vm1, %v114_v36  ;;  %v286_v36 = vld [vmem:[%s915_s4 + $0x20] sm:$0xff] }
 0x10c   :  { %v111_v37 = vpop.f32.mrf.mxu1 }
 0x10d   :  { %v112_v38 = vadd.f32 %v567_v33, %v111_v37  ;;  %v289_v33 = vld [vmem:[%s915_s4 + $0x38] sm:$0xff] }
 0x10e   :  { %313 = vmatpush.msra.mxu0 %v289_v33  ;;  %v447_v33 = vld [vmem:[%s916_s5 + $0x8] sm:$0xff] }
 0x10f   :  { %v115_v39 = vmax.f32 %v112_v38, 0.0 }
 0x110   :  { %314 = vmatpush.msra.mxu0 %v288_v34  ;;  %v446_v34 = vld [vmem:[%s916_s5] sm:$0xff] }
 0x111   :  { %543 = vmatmul.msk.f32.gmra.mxu3 %vm84_vm1, %v115_v39 }
 0x112   :  { %315 = vmatpush.msra.mxu0 %v287_v35 }
 0x114   :  { %316 = vmatpush.msra.mxu0 %v286_v36 }
 0x18c   :  { %v184_v42 = vpop.f32.mrf.mxu3 }
 0x18d   :  { %v185_v43 = vadd.f32 %v184_v42, %v155_v40 }
 0x18f   :  { %v191_v44 = vadd.f32 %v568_v41, %v185_v43  ;;  %v569_v43 = vld [vmem:[%s911_s6 + $0x3] ss:$0 sm:$0xff] }
 0x191   :  { %572 = vtanh.f32 %v191_v44  ;;  %v544_v51 = vmul.f32 -1.442695, %v191_v44 }
 0x194   :  { %v187_v46 = vpop.f32.mrf.mxu3 }
 0x195   :  { %v188_v47 = vadd.f32 %v187_v46, %v158_v45 }
 0x197   :  { %v573_v48 = vpop.eup %572  ;;  %v192_v49 = vadd.f32 %v568_v41, %v188_v47 }
 0x198   :  { %237 = vrot.lane.b32.xlu0 %v573_v48, %s604_s17 }
 0x199   :  { %574 = vtanh.f32 %v192_v49  ;;  %v545_v52 = vmul.f32 -1.442695, %v192_v49 }
 0x19a   :  { %576 = vpow2.f32 %v544_v51 }
 0x19b   :  { %578 = vpow2.f32 %v545_v52 }
 0x19f   :  { %v575_v50 = vpop.eup %574 }
 0x1a0   :  { %239 = vrot.lane.b32.xlu0 %v575_v50, %s604_s17  ;;  %v577_v53 = vpop.eup %576 }
 0x1a1   :  { %v199_v54 = vadd.f32 1.0, %v577_v53  ;;  %v579_v55 = vpop.eup %578 }
 0x1a2   :  { %v200_v56 = vadd.f32 1.0, %v579_v55 }
 0x1a3   :  { %580 = vrcp.f32 %v199_v54  ;;  %v212_v1 = vand.u32 2147483648, %v199_v54  ;;  %vm206_vm4 = vweird.f32 %v199_v54  ;;  %v210_v2 = vand.u32 2147483647, %v199_v54 }
 0x1a4   :  { %582 = vrcp.f32 %v200_v56  ;;  %v227_v10 = vand.u32 2147483648, %v200_v56  ;;  %vm221_vm8 = vweird.f32 %v200_v56  ;;  %v225_v11 = vand.u32 2147483647, %v200_v56 }
 0x1a5   :  { %v213_v5 = vor.u32 1.1754944e-38, %v212_v1  ;;  %vm211_vm6 = vcmp.eq.f32.partialorder %v210_v2, 8.507059e+37 }
 0x1a6   :  { %v228_v13 = vor.u32 1.1754944e-38, %v227_v10  ;;  %vm226_vm10 = vcmp.eq.f32.partialorder %v225_v11, 8.507059e+37 }
 0x1a9   :  { %v581_v57 = vpop.eup %580 }
 0x1aa   :  { %v202_v58 = vmul.f32 %v581_v57, %v199_v54  ;;  %v583_v60 = vpop.eup %582  ;;  %vm207_vm3 = vweird.f32 %v581_v57 }
 0x1ab   :  { %v217_v62 = vmul.f32 %v583_v60, %v200_v56  ;;  %vm208_vm5 = vmor %vm206_vm4, %vm207_vm3  ;;  %vm222_vm7 = vweird.f32 %v583_v60 }
 0x1ac   :  { %v203_v59 = vsub.f32 1.0, %v202_v58  ;;  %vm223_vm9 = vmor %vm221_vm8, %vm222_vm7  ;;  %vm441_vm7 = vcmask 1048320  }
 0x1ad   :  { %v218_v0 = vsub.f32 1.0, %v217_v62 }
 0x1ae   :  { %v204_v61 = vmul.f32 %v581_v57, %v203_v59 }
 0x1af   :  { %v219_v4 = vmul.f32 %v583_v60, %v218_v0 }
 0x1b0   :  { %v205_v63 = vadd.f32 %v581_v57, %v204_v61 }
 0x1b1   :  { %v220_v9 = vadd.f32 %v583_v60, %v219_v4 }
 0x1b2   :  { %v209_v3 = vsel %vm208_vm5, %v581_v57, %v205_v63 }
 0x1b3   :  { %v214_v7 = vsel %vm211_vm6, %v213_v5, %v209_v3  ;;  %v224_v12 = vsel %vm223_vm9, %v583_v60, %v220_v9  ;;  %vm430_vm6 = vcmask 785920  }
 0x1b4   :  { %v229_v14 = vsel %vm226_vm10, %v228_v13, %v224_v12  ;;  %v233_v17 = vmul.f32 %v214_v7, %v733_v31 }
 0x1b5   :  { %v234_v20 = vmul.f32 %v229_v14, %v744_v32 }
 0x20a   :  { %v238_v6 = vpop.permute.xlu0 %237 }
 0x20b   :  { %v243_v8 = vmul.f32 %v238_v6, %v214_v7 }
 0x20d   :  { %247 = vrot.lane.b32.xlu1 %v243_v8, %s604_s17 }
 0x212   :  { %v240_v15 = vpop.permute.xlu0 %239 }
 0x213   :  { %v244_v16 = vmul.f32 %v240_v15, %v229_v14 }
 0x215   :  { %249 = vrot.lane.b32.xlu1 %v244_v16, %s604_s17 }
 0x27f   :  { %v248_v18 = vpop.permute.xlu1 %247 }
 0x280   :  { %v253_v19 = vadd.f32 %v248_v18, %v233_v17 }
 0x282   :  { %584 = vtanh.f32 %v253_v19 }
 0x287   :  { %v250_v21 = vpop.permute.xlu1 %249 }
 0x288   :  { %v585_v22 = vpop.eup %584  ;;  %v254_v23 = vadd.f32 %v250_v21, %v234_v20 }
 0x289   :  { %259 = vrot.lane.b32.xlu2 %v585_v22, %s604_s17 }
 0x28a   :  { %586 = vtanh.f32 %v254_v23 }
 0x290   :  { %v587_v24 = vpop.eup %586 }
 0x291   :  { %261 = vrot.lane.b32.xlu2 %v587_v24, %s604_s17 }
 0x2e3   :  { %v260_v29 = vpop.permute.xlu2 %259 }
 0x2e4   :  { %v265_v30 = vmul.f32 %v260_v29, %v214_v7 }
 0x2e6   :  { %269 = vrot.lane.b32.xlu0 %v265_v30, %s605_s26 }
 0x2eb   :  { %v262_v31 = vpop.permute.xlu2 %261 }
 0x2ec   :  { %v266_v32 = vmul.f32 %v262_v31, %v229_v14  ;;  %v449_v31 = vld [vmem:[%s916_s5 + $0x18] sm:$0xff] }
 0x2ed   :  { %483 = vmatpush.msrb.mxu1 %v449_v31 }
 0x2ee   :  { %271 = vrot.lane.b32.xlu1 %v266_v32, %s605_s26  ;;  %v448_v32 = vld [vmem:[%s916_s5 + $0x10] sm:$0xff] }
 0x2ef   :  { %484 = vmatpush.msrb.mxu1 %v448_v32 }
 0x2f1   :  { %485 = vmatpush.msrb.mxu1 %v447_v33 }
 0x2f3   :  { %486 = vmatpush.msrb.mxu1 %v446_v34 }
 0x358   :  { %v270_v37 = vpop.permute.xlu0 %269 }
 0x359   :  { %275 = vst.msk [vmem:[%s914_s8] sm:$0xff] %vm131_vm2, %v270_v37  ;;  %548 = vmatmul.msk.f32.vlgmr.msrb.gmra.mxu2 %vm131_vm2, %v270_v37 }
 0x35a   :  { %278 = vst.msk [vmem:[%s914_s8] sm:$0xff] %vm277_vm11, %v253_v19 }
 0x360   :  { %v272_v38 = vpop.permute.xlu1 %271 }
 0x361   :  { %276 = vst.msk [vmem:[%s914_s8 + $0x8] sm:$0xff] %vm131_vm2, %v272_v38  ;;  %549 = vmatmul.msk.f32.gmra.mxu2 %vm131_vm2, %v272_v38  ;;  %v280_v39 = vld [vmem:[%s914_s8] sm:$0xff] }
 0x362   :  { %279 = vst.msk [vmem:[%s914_s8 + $0x8] sm:$0xff] %vm277_vm11, %v254_v23  ;;  %293 = vrot.lane.b32.xlu2 %v280_v39, %s605_s26  ;;  %v457_v39 = vld [vmem:[%s916_s5 + $0x58] sm:$0xff] }
 0x363   :  { %511 = vmatpush.msrb.mxu3 %v457_v39 }
 0x369   :  { %v281_v40 = vld [vmem:[%s914_s8 + $0x8] sm:$0xff] }
 0x36a   :  { %295 = vrot.lane.b32.xlu0 %v281_v40, %s605_s26  ;;  %v456_v40 = vld [vmem:[%s916_s5 + $0x50] sm:$0xff] }
 0x36b   :  { %512 = vmatpush.msrb.mxu3 %v456_v40 }
 0x3bc   :  { %v818_v41 = vpop.permute.xlu2 %293 }
 0x3bd   :  { %546 = vmatmul.msk.f32.vlgmr.msra.gmra.mxu0 %vm131_vm2, %v818_v41 }
 0x3dc   :  { %v822_v42 = vpop.permute.xlu0 %295  ;;  %v345_v44 = vpop.f32.mrf.mxu2 }
 0x3dd   :  { %547 = vmatmul.msk.f32.gmra.mxu0 %vm131_vm2, %v822_v42 }
 0x3e4   :  { %v348_v49 = vpop.f32.mrf.mxu2 }
 0x43a   :  { %v318_v45 = vpop.f32.mrf.mxu0 }
 0x43b   :  { %v346_v46 = vadd.f32 %v345_v44, %v318_v45  ;;  %v452_v44 = vld [vmem:[%s916_s5 + $0x30] sm:$0xff] }
 0x43d   :  { %v352_v47 = vadd.f32 %v569_v43, %v346_v46 }
 0x43f   :  { %588 = vtanh.f32 %v352_v47  ;;  %v550_v54 = vmul.f32 -1.442695, %v352_v47 }
 0x445   :  { %v589_v48 = vpop.eup %588 }
 0x446   :  { %400 = vrot.lane.b32.xlu1 %v589_v48, %s604_s17  ;;  %v451_v48 = vld [vmem:[%s916_s5 + $0x28] sm:$0xff] }
 0x45a   :  { %v321_v50 = vpop.f32.mrf.mxu0 }
 0x45b   :  { %v349_v51 = vadd.f32 %v348_v49, %v321_v50  ;;  %v450_v49 = vld [vmem:[%s916_s5 + $0x20] sm:$0xff] }
 0x45c   :  { %v570_v50 = vld [vmem:[%s911_s6 + $0x4] ss:$0 sm:$0xff] }
 0x45d   :  { %v353_v52 = vadd.f32 %v569_v43, %v349_v51  ;;  %v453_v43 = vld [vmem:[%s916_s5 + $0x38] sm:$0xff] }
 0x45f   :  { %590 = vtanh.f32 %v353_v52  ;;  %v551_v55 = vmul.f32 -1.442695, %v353_v52 }
 0x460   :  { %592 = vpow2.f32 %v550_v54 }
 0x461   :  { %594 = vpow2.f32 %v551_v55 }
 0x465   :  { %v591_v53 = vpop.eup %590 }
 0x466   :  { %402 = vrot.lane.b32.xlu2 %v591_v53, %s604_s17  ;;  %v593_v56 = vpop.eup %592 }
 0x467   :  { %v360_v57 = vadd.f32 1.0, %v593_v56  ;;  %v595_v58 = vpop.eup %594 }
 0x468   :  { %v361_v59 = vadd.f32 1.0, %v595_v58 }
 0x469   :  { %596 = vrcp.f32 %v360_v57  ;;  %v373_v4 = vand.u32 2147483648, %v360_v57  ;;  %vm367_vm13 = vweird.f32 %v360_v57  ;;  %v371_v5 = vand.u32 2147483647, %v360_v57 }
 0x46a   :  { %598 = vrcp.f32 %v361_v59  ;;  %v388_v13 = vand.u32 2147483648, %v361_v59  ;;  %vm382_vm3 = vweird.f32 %v361_v59  ;;  %v386_v14 = vand.u32 2147483647, %v361_v59 }
 0x46b   :  { %v374_v8 = vor.u32 1.1754944e-38, %v373_v4  ;;  %vm372_vm15 = vcmp.eq.f32.partialorder %v371_v5, 8.507059e+37 }
 0x46c   :  { %v389_v16 = vor.u32 1.1754944e-38, %v388_v13  ;;  %vm387_vm5 = vcmp.eq.f32.partialorder %v386_v14, 8.507059e+37 }
 0x46f   :  { %v597_v60 = vpop.eup %596 }
 0x470   :  { %v363_v61 = vmul.f32 %v597_v60, %v360_v57  ;;  %v599_v63 = vpop.eup %598  ;;  %vm368_vm12 = vweird.f32 %v597_v60  ;;  %v571_v57 = vld [vmem:[%s911_s6 + $0x5] ss:$0 sm:$0xff] }
 0x471   :  { %v378_v1 = vmul.f32 %v599_v63, %v361_v59  ;;  %vm369_vm14 = vmor %vm367_vm13, %vm368_vm12  ;;  %vm383_vm0 = vweird.f32 %v599_v63 }
 0x472   :  { %v364_v62 = vsub.f32 1.0, %v363_v61  ;;  %vm384_vm4 = vmor %vm382_vm3, %vm383_vm0 }
 0x473   :  { %v379_v3 = vsub.f32 1.0, %v378_v1 }
 0x474   :  { %v365_v0 = vmul.f32 %v597_v60, %v364_v62 }
 0x475   :  { %v380_v7 = vmul.f32 %v599_v63, %v379_v3 }
 0x476   :  { %v366_v2 = vadd.f32 %v597_v60, %v365_v0 }
 0x477   :  { %v381_v12 = vadd.f32 %v599_v63, %v380_v7 }
 0x478   :  { %v370_v6 = vsel %vm369_vm14, %v597_v60, %v366_v2 }
 0x479   :  { %v375_v10 = vsel %vm372_vm15, %v374_v8, %v370_v6  ;;  %v385_v15 = vsel %vm384_vm4, %v599_v63, %v381_v12 }
 0x47a   :  { %v390_v18 = vsel %vm387_vm5, %v389_v16, %v385_v15  ;;  %v396_v20 = vmul.f32 %v375_v10, %v818_v41  ;;  %v455_v41 = vld [vmem:[%s916_s5 + $0x48] sm:$0xff] }
 0x47b   :  { %v397_v23 = vmul.f32 %v390_v18, %v822_v42  ;;  %v454_v42 = vld [vmem:[%s916_s5 + $0x40] sm:$0xff]  ;;  %513 = vmatpush.msrb.mxu3 %v455_v41 }
 0x47d   :  { %514 = vmatpush.msrb.mxu3 %v454_v42 }
 0x47f   :  { %515 = vmatpush.msrb.mxu3 %v453_v43 }
 0x481   :  { %516 = vmatpush.msrb.mxu3 %v452_v44 }
 0x483   :  { %517 = vmatpush.msrb.mxu3 %v451_v48 }
 0x485   :  { %518 = vmatpush.msrb.mxu3 %v450_v49 }
 0x4b8   :  { %v401_v9 = vpop.permute.xlu1 %400 }
 0x4b9   :  { %v406_v11 = vmul.f32 %v401_v9, %v375_v10 }
 0x4bb   :  { %410 = vrot.lane.b32.xlu0 %v406_v11, %s604_s17 }
 0x4c0   :  { %v403_v17 = vpop.permute.xlu2 %402 }
 0x4c1   :  { %v407_v19 = vmul.f32 %v403_v17, %v390_v18 }
 0x4c3   :  { %412 = vrot.lane.b32.xlu1 %v407_v19, %s604_s17 }
 0x52d   :  { %v411_v21 = vpop.permute.xlu0 %410 }
 0x52e   :  { %v416_v22 = vadd.f32 %v411_v21, %v396_v20 }
 0x530   :  { %600 = vtanh.f32 %v416_v22 }
 0x535   :  { %v413_v24 = vpop.permute.xlu1 %412 }
 0x536   :  { %v601_v25 = vpop.eup %600  ;;  %v417_v26 = vadd.f32 %v413_v24, %v397_v23 }
 0x537   :  { %422 = vrot.lane.b32.xlu2 %v601_v25, %s604_s17 }
 0x538   :  { %602 = vtanh.f32 %v417_v26 }
 0x53e   :  { %v603_v27 = vpop.eup %602 }
 0x53f   :  { %424 = vrot.lane.b32.xlu0 %v603_v27, %s604_s17 }
 0x547   :  { %435 = vrot.lane.b32.xlu0 %v416_v22, %s605_s26 }
 0x591   :  { %v423_v28 = vpop.permute.xlu2 %422 }
 0x592   :  { %v428_v29 = vmul.f32 %v423_v28, %v375_v10 }
 0x594   :  { %v444_v30 = vmax.f32 %v428_v29, 0.0  ;;  %431 = vst.msk [vmem:[%s914_s8] sm:$0xff] %vm430_vm6, %v428_v29 }
 0x596   :  { %463 = vrot.lane.b32.xlu1 %v444_v30, %s605_s26 }
 0x59e   :  { %437 = vrot.lane.b32.xlu1 %v417_v26, %s605_s26 }
 0x5b1   :  { %v425_v35 = vpop.permute.xlu0 %424 }
 0x5b2   :  { %v429_v36 = vmul.f32 %v425_v35, %v390_v18 }
 0x5b4   :  { %v445_v37 = vmax.f32 %v429_v36, 0.0  ;;  %432 = vst.msk [vmem:[%s914_s8 + $0x8] sm:$0xff] %vm430_vm6, %v429_v36 }
 0x5b6   :  { %465 = vrot.lane.b32.xlu2 %v445_v37, %s605_s26 }
 0x5b9   :  { %v436_v38 = vpop.permute.xlu0 %435 }
 0x5ba   :  { %442 = vst.msk [vmem:[%s914_s8] sm:$0xff] %vm441_vm7, %v436_v38 }
 0x608   :  { %v464_v45 = vpop.permute.xlu1 %463 }
 0x609   :  { %552 = vmatmul.msk.f32.vlgmr.msrb.gmra.mxu1 %vm131_vm2, %v464_v45 }
 0x610   :  { %v438_v46 = vpop.permute.xlu1 %437  ;;  %v466_v47 = vpop.permute.xlu2 %465 }
 0x611   :  { %443 = vst.msk [vmem:[%s914_s8 + $0x8] sm:$0xff] %vm441_vm7, %v438_v46  ;;  %553 = vmatmul.msk.f32.gmra.mxu1 %vm131_vm2, %v466_v47 }
 0x686   :  { %v488_v51 = vpop.f32.mrf.mxu1 }
 0x687   :  { %v489_v52 = vadd.f32 %v570_v50, %v488_v51 }
 0x689   :  { %v494_v53 = vmax.f32 %v489_v52, 0.0 }
 0x68b   :  { %554 = vmatmul.msk.f32.vlgmr.msrb.gmra.mxu3 %vm84_vm1, %v494_v53 }
 0x68e   :  { %v491_v54 = vpop.f32.mrf.mxu1 }
 0x68f   :  { %v492_v55 = vadd.f32 %v570_v50, %v491_v54 }
 0x691   :  { %v495_v56 = vmax.f32 %v492_v55, 0.0 }
 0x693   :  { %555 = vmatmul.msk.f32.gmra.mxu3 %vm84_vm1, %v495_v56 }
 0x70e   :  { %v520_v58 = vpop.f32.mrf.mxu3 }
 0x70f   :  { %v521_v59 = vadd.f32 %v571_v57, %v520_v58 }
 0x711   :  { %526 = vst [vmem:[%s917_s7] sm:$0xff] %v521_v59 }
 0x716   :  { %v523_v60 = vpop.f32.mrf.mxu3 }
 0x717   :  { %v524_v61 = vadd.f32 %v571_v57, %v523_v60 }
 0x719   :  { %527 = vst [vmem:[%s917_s7 + $0x8] sm:$0xff] %v524_v61 }

</bundles_post_ra>
